<compile_context>
chip_gen: v5e
topology: v5e:2x2
jax: 0.10.0
libtpu: 0.0.40
codegen_flags: <defaults>
</compile_context>

<pallas_src>
import jax
import jax.numpy as jnp
from jax.experimental import pallas as pl
from jax.experimental.pallas import tpu as pltpu


def critic_kernel(s_ref, a_ref, w1s_ref, w1a_ref, b1_ref,
                  w2_ref, b2_ref, w3_ref, b3_ref, out_ref):
    # fc1 over the (fused) concatenation [state, action]: bf16 MXU, f32 accumulation.
    h1 = jnp.dot(s_ref[...], w1s_ref[...], preferred_element_type=jnp.float32)
    h1 = h1 + jnp.dot(a_ref[...], w1a_ref[...], preferred_element_type=jnp.float32)
    h1 = jnp.maximum(h1 + b1_ref[...], 0.0)          # ReLU (only after fc1, per spec)

    # fc2 (NO ReLU afterwards, matching the PyTorch forward).
    h2 = jnp.dot(h1.astype(jnp.bfloat16), w2_ref[...],
                 preferred_element_type=jnp.float32) + b2_ref[...]

    # q head (out_features == 1): VPU multiply + lane reduction instead of an N=1 matmul.
    q = jnp.sum(h2 * w3_ref[...], axis=-1, keepdims=True) + b3_ref[...]

    # Lane-dense store: broadcast the per-row scalar across 128 lanes (unmasked vst).
    out_ref[...] = jnp.broadcast_to(q, out_ref.shape).astype(out_ref.dtype)


def critic_network_forward(state, action, params, *, tile_b=128):
    """state: (B, Ds) f32, action: (B, Da) f32  ->  q: (B, 1) f32."""
    assert tile_b % 16 == 0, "tile_b must be a multiple of 16 (bf16 sublane packing)"
    B, Ds = state.shape
    Da = action.shape[1]
    fc1 = params["w1"].shape[1]
    fc2 = params["w2"].shape[1]

    # bf16 weights/inputs for the MXU matmuls (accumulation stays f32 in-kernel).
    w1_bf = params["w1"].astype(jnp.bfloat16)
    w1s, w1a = w1_bf[:Ds], w1_bf[Ds:]                 # fused concat: split fc1 weight
    w2_bf = params["w2"].astype(jnp.bfloat16)
    b1, b2 = params["b1"], params["b2"]
    w3_row = params["w3"].reshape(1, fc2)             # (1, fc2) f32 row for the VPU head
    b3 = params["b3"].reshape(1, 1)

    s_bf = state.astype(jnp.bfloat16)
    a_bf = action.astype(jnp.bfloat16)

    # Pad the batch to a multiple of tile_b so the grid tiles evenly.
    n_tiles = pl.cdiv(B, tile_b)
    Bp = n_tiles * tile_b
    if Bp != B:
        pad = Bp - B
        s_bf = jnp.pad(s_bf, ((0, pad), (0, 0)))
        a_bf = jnp.pad(a_bf, ((0, pad), (0, 0)))

    out = pl.pallas_call(
        critic_kernel,
        out_shape=jax.ShapeDtypeStruct((Bp, 128), jnp.float32),
        grid=(n_tiles,),
        in_specs=[
            pl.BlockSpec((tile_b, Ds), lambda i: (i, 0)),   # state tile (pipelined)
            pl.BlockSpec((tile_b, Da), lambda i: (i, 0)),   # action tile (pipelined)
            pl.BlockSpec((Ds, fc1), lambda i: (0, 0)),      # w1 state part (VMEM-resident)
            pl.BlockSpec((Da, fc1), lambda i: (0, 0)),      # w1 action part (VMEM-resident)
            pl.BlockSpec((1, fc1), lambda i: (0, 0)),       # b1
            pl.BlockSpec((fc1, fc2), lambda i: (0, 0)),     # w2 (VMEM-resident)
            pl.BlockSpec((1, fc2), lambda i: (0, 0)),       # b2
            pl.BlockSpec((1, fc2), lambda i: (0, 0)),       # w3 row (f32, VPU head)
            pl.BlockSpec((1, 1), lambda i: (0, 0)),         # b3
        ],
        out_specs=pl.BlockSpec((tile_b, 128), lambda i: (i, 0)),
        compiler_params=pltpu.CompilerParams(
            dimension_semantics=("parallel",),              # shards batch tiles across TCs on v7x
        ),
    )(s_bf, a_bf, w1s, w1a, b1, w2_bf, b2, w3_row, b3)

    return out[:B, :1]


def init_params(key, input_dim, n_actions, fc1_dims=256, fc2_dims=256):
    """Deterministic init mimicking nn.Linear's U(-1/sqrt(fan_in), 1/sqrt(fan_in))."""
    ks = jax.random.split(key, 6)

    def linear(kw, kb, fan_in, fan_out):
        bound = 1.0 / jnp.sqrt(jnp.float32(fan_in))
        w = jax.random.uniform(kw, (fan_in, fan_out), jnp.float32, -bound, bound)
        b = jax.random.uniform(kb, (1, fan_out), jnp.float32, -bound, bound)
        return w, b

    in_dim = input_dim + n_actions
    w1, b1 = linear(ks[0], ks[1], in_dim, fc1_dims)
    w2, b2 = linear(ks[2], ks[3], fc1_dims, fc2_dims)
    w3, b3 = linear(ks[4], ks[5], fc2_dims, 1)
    return {"w1": w1, "b1": b1, "w2": w2, "b2": b2, "w3": w3, "b3": b3}


if __name__ == "__main__":
    key = jax.random.PRNGKey(0)
    k_s, k_a, k_p = jax.random.split(key, 3)

    B, Ds, Da = 64, 16, 4                     # small batch / obs dim / action dim
    state = jax.random.normal(k_s, (B, Ds), jnp.float32)
    action = jax.random.normal(k_a, (B, Da), jnp.float32)
    params = init_params(k_p, Ds, Da, fc1_dims=256, fc2_dims=256)

    q = critic_network_forward(state, action, params, tile_b=32)   # grid of 2 batch tiles
    q = jax.block_until_ready(q)

    # Pure-JAX reference with matching bf16-weight / f32-accumulation numerics.
    x = jnp.concatenate([state, action], axis=1)
    h1 = jnp.maximum(
        jnp.dot(x.astype(jnp.bfloat16), params["w1"].astype(jnp.bfloat16),
                preferred_element_type=jnp.float32) + params["b1"], 0.0)
    h2 = jnp.dot(h1.astype(jnp.bfloat16), params["w2"].astype(jnp.bfloat16),
                 preferred_element_type=jnp.float32) + params["b2"]
    q_ref = h2 @ params["w3"] + params["b3"]

    assert q.shape == (B, 1)
    assert jnp.allclose(q, q_ref, atol=1e-2, rtol=1e-2), \
        f"max abs err {jnp.max(jnp.abs(q - q_ref))}"

    print("KERNEL_OK")
</pallas_src>

<mosaic_0001>
module attributes {stable_mosaic.version = 11 : i64} {
  func.func @critic_kernel(%arg0: i32, %arg1: memref<32x16xbf16, #tpu.memory_space<vmem>>, %arg2: memref<32x4xbf16, #tpu.memory_space<vmem>>, %arg3: memref<16x256xbf16, #tpu.memory_space<vmem>>, %arg4: memref<4x256xbf16, #tpu.memory_space<vmem>>, %arg5: memref<1x256xf32, #tpu.memory_space<vmem>>, %arg6: memref<256x256xbf16, #tpu.memory_space<vmem>>, %arg7: memref<1x256xf32, #tpu.memory_space<vmem>>, %arg8: memref<1x256xf32, #tpu.memory_space<vmem>>, %arg9: memref<1x1xf32, #tpu.memory_space<vmem>>, %arg10: memref<32x128xf32, #tpu.memory_space<vmem>>) attributes {dimension_semantics = [#tpu.dimension_semantics<parallel>], iteration_bounds = array<i64: 2>, scalar_prefetch = 0 : i64, scratch_operands = 0 : i64, tpu.core_type = #tpu.core_type<tc>, window_params = [{transform_indices = @transform_0, window_bounds = array<i64: 32, 16>}, {transform_indices = @transform_1, window_bounds = array<i64: 32, 4>}, {pipeline_mode = #tpu.pipeline_mode<synchronous>, transform_indices = @transform_2, window_bounds = array<i64: 16, 256>}, {pipeline_mode = #tpu.pipeline_mode<synchronous>, transform_indices = @transform_3, window_bounds = array<i64: 4, 256>}, {pipeline_mode = #tpu.pipeline_mode<synchronous>, transform_indices = @transform_4, window_bounds = array<i64: 1, 256>}, {pipeline_mode = #tpu.pipeline_mode<synchronous>, transform_indices = @transform_5, window_bounds = array<i64: 256, 256>}, {pipeline_mode = #tpu.pipeline_mode<synchronous>, transform_indices = @transform_6, window_bounds = array<i64: 1, 256>}, {pipeline_mode = #tpu.pipeline_mode<synchronous>, transform_indices = @transform_7, window_bounds = array<i64: 1, 256>}, {pipeline_mode = #tpu.pipeline_mode<synchronous>, transform_indices = @transform_8, window_bounds = array<i64: 1, 1>}, {transform_indices = @transform_9, window_bounds = array<i64: 32, 128>}]} {
    %c0 = arith.constant 0 : index
    %c0_0 = arith.constant 0 : index
    %0 = vector.load %arg1[%c0, %c0_0] : memref<32x16xbf16, #tpu.memory_space<vmem>>, vector<32x16xbf16>
    %c0_1 = arith.constant 0 : index
    %c0_2 = arith.constant 0 : index
    %1 = vector.load %arg3[%c0_1, %c0_2] : memref<16x256xbf16, #tpu.memory_space<vmem>>, vector<16x256xbf16>
    %cst = arith.constant dense<0.000000e+00> : vector<32x256xf32>
    %2 = tpu.matmul %0, %1, %cst {dimension_numbers = #tpu.dot_dimension_numbers<[1], [0], [0], [1], [0, 0, 1, 1], [], []>} : vector<32x16xbf16>, vector<16x256xbf16>, vector<32x256xf32> -> vector<32x256xf32>
    %c0_3 = arith.constant 0 : index
    %c0_4 = arith.constant 0 : index
    %3 = vector.load %arg2[%c0_3, %c0_4] : memref<32x4xbf16, #tpu.memory_space<vmem>>, vector<32x4xbf16>
    %c0_5 = arith.constant 0 : index
    %c0_6 = arith.constant 0 : index
    %4 = vector.load %arg4[%c0_5, %c0_6] : memref<4x256xbf16, #tpu.memory_space<vmem>>, vector<4x256xbf16>
    %cst_7 = arith.constant dense<0.000000e+00> : vector<32x256xf32>
    %5 = tpu.matmul %3, %4, %cst_7 {dimension_numbers = #tpu.dot_dimension_numbers<[1], [0], [0], [1], [0, 0, 1, 1], [], []>} : vector<32x4xbf16>, vector<4x256xbf16>, vector<32x256xf32> -> vector<32x256xf32>
    %6 = arith.addf %2, %5 : vector<32x256xf32>
    %c0_8 = arith.constant 0 : index
    %c0_9 = arith.constant 0 : index
    %7 = vector.load %arg5[%c0_8, %c0_9] : memref<1x256xf32, #tpu.memory_space<vmem>>, vector<1x256xf32>
    %8 = vector.broadcast %7 : vector<1x256xf32> to vector<32x256xf32>
    %9 = arith.addf %6, %8 : vector<32x256xf32>
    %cst_10 = arith.constant 0.000000e+00 : f32
    %10 = vector.broadcast %cst_10 : f32 to vector<32x256xf32>
    %11 = arith.maximumf %9, %10 : vector<32x256xf32>
    %12 = arith.truncf %11 : vector<32x256xf32> to vector<32x256xbf16>
    %c0_11 = arith.constant 0 : index
    %c0_12 = arith.constant 0 : index
    %13 = vector.load %arg6[%c0_11, %c0_12] : memref<256x256xbf16, #tpu.memory_space<vmem>>, vector<256x256xbf16>
    %cst_13 = arith.constant dense<0.000000e+00> : vector<32x256xf32>
    %14 = tpu.matmul %12, %13, %cst_13 {dimension_numbers = #tpu.dot_dimension_numbers<[1], [0], [0], [1], [0, 0, 1, 1], [], []>} : vector<32x256xbf16>, vector<256x256xbf16>, vector<32x256xf32> -> vector<32x256xf32>
    %c0_14 = arith.constant 0 : index
    %c0_15 = arith.constant 0 : index
    %15 = vector.load %arg7[%c0_14, %c0_15] : memref<1x256xf32, #tpu.memory_space<vmem>>, vector<1x256xf32>
    %16 = vector.broadcast %15 : vector<1x256xf32> to vector<32x256xf32>
    %17 = arith.addf %14, %16 : vector<32x256xf32>
    %c0_16 = arith.constant 0 : index
    %c0_17 = arith.constant 0 : index
    %18 = vector.load %arg8[%c0_16, %c0_17] : memref<1x256xf32, #tpu.memory_space<vmem>>, vector<1x256xf32>
    %19 = vector.broadcast %18 : vector<1x256xf32> to vector<32x256xf32>
    %20 = arith.mulf %17, %19 : vector<32x256xf32>
    %cst_18 = arith.constant dense<0.000000e+00> : vector<32xf32>
    %21 = vector.multi_reduction <add>, %20, %cst_18 [1] : vector<32x256xf32> to vector<32xf32>
    %22 = vector.shape_cast %21 : vector<32xf32> to vector<32x1xf32>
    %c0_19 = arith.constant 0 : index
    %c0_20 = arith.constant 0 : index
    %23 = vector.load %arg9[%c0_19, %c0_20] : memref<1x1xf32, #tpu.memory_space<vmem>>, vector<1x1xf32>
    %24 = vector.broadcast %23 : vector<1x1xf32> to vector<32x1xf32>
    %25 = arith.addf %22, %24 : vector<32x1xf32>
    %26 = vector.shape_cast %25 : vector<32x1xf32> to vector<32x1xf32>
    %27 = vector.broadcast %26 : vector<32x1xf32> to vector<32x128xf32>
    %c0_21 = arith.constant 0 : index
    %c0_22 = arith.constant 0 : index
    %28 = vector.load %arg10[%c0_21, %c0_22] : memref<32x128xf32, #tpu.memory_space<vmem>>, vector<32x128xf32>
    tpu.vector_store %arg10[%c0_21, %c0_22], %27 {strides = array<i32>} : memref<32x128xf32, #tpu.memory_space<vmem>>, vector<32x128xf32>,
    return
  }
  func.func @transform_0(%arg0: i32) -> (i32, i32) {
    %c0_i32 = arith.constant 0 : i32
    %c0_i32_0 = arith.constant 0 : i32
    return %arg0, %c0_i32 : i32, i32
  }
  func.func @transform_1(%arg0: i32) -> (i32, i32) {
    %c0_i32 = arith.constant 0 : i32
    %c0_i32_0 = arith.constant 0 : i32
    return %arg0, %c0_i32 : i32, i32
  }
  func.func @transform_2(%arg0: i32) -> (i32, i32) {
    %c0_i32 = arith.constant 0 : i32
    %c0_i32_0 = arith.constant 0 : i32
    %c0_i32_1 = arith.constant 0 : i32
    return %c0_i32, %c0_i32_0 : i32, i32
  }
  func.func @transform_3(%arg0: i32) -> (i32, i32) {
    %c0_i32 = arith.constant 0 : i32
    %c0_i32_0 = arith.constant 0 : i32
    %c0_i32_1 = arith.constant 0 : i32
    return %c0_i32, %c0_i32_0 : i32, i32
  }
  func.func @transform_4(%arg0: i32) -> (i32, i32) {
    %c0_i32 = arith.constant 0 : i32
    %c0_i32_0 = arith.constant 0 : i32
    %c0_i32_1 = arith.constant 0 : i32
    return %c0_i32, %c0_i32_0 : i32, i32
  }
  func.func @transform_5(%arg0: i32) -> (i32, i32) {
    %c0_i32 = arith.constant 0 : i32
    %c0_i32_0 = arith.constant 0 : i32
    %c0_i32_1 = arith.constant 0 : i32
    return %c0_i32, %c0_i32_0 : i32, i32
  }
  func.func @transform_6(%arg0: i32) -> (i32, i32) {
    %c0_i32 = arith.constant 0 : i32
    %c0_i32_0 = arith.constant 0 : i32
    %c0_i32_1 = arith.constant 0 : i32
    return %c0_i32, %c0_i32_0 : i32, i32
  }
  func.func @transform_7(%arg0: i32) -> (i32, i32) {
    %c0_i32 = arith.constant 0 : i32
    %c0_i32_0 = arith.constant 0 : i32
    %c0_i32_1 = arith.constant 0 : i32
    return %c0_i32, %c0_i32_0 : i32, i32
  }
  func.func @transform_8(%arg0: i32) -> (i32, i32) {
    %c0_i32 = arith.constant 0 : i32
    %c0_i32_0 = arith.constant 0 : i32
    %c0_i32_1 = arith.constant 0 : i32
    return %c0_i32, %c0_i32_0 : i32, i32
  }
  func.func @transform_9(%arg0: i32) -> (i32, i32) {
    %c0_i32 = arith.constant 0 : i32
    %c0_i32_0 = arith.constant 0 : i32
    return %arg0, %c0_i32 : i32, i32
  }
}

</mosaic_0001>

<bundles_post_ra>
// kernel: tpu_custom_call.1
= control target key start
LH: loop header
LB: loop body
LE: loop exit
PB: predicated region body
PF: predicated region fallthrough
CT: control target
= control target key end

     0   :  { %s1546_s0 = inlined_call_operand.vmem [shape: bf16[64,16], index: 0, kind: input, shape index: {}]   ;;  %s1547_s1 = inlined_call_operand.vmem [shape: bf16[64,4], index: 1, kind: input, shape index: {}]   ;;  %s1548_s2 = inlined_call_operand.vmem [shape: bf16[16,256], index: 2, kind: input, shape index: {}]   ;;  %s1549_s3 = inlined_call_operand.vmem [shape: bf16[4,256], index: 3, kind: input, shape index: {}]   ;;  %s1550_s4 = inlined_call_operand.vmem [shape: f32[1,256], index: 4, kind: input, shape index: {}]   ;;  %s1551_s5 = inlined_call_operand.hbm [shape: bf16[256,256], index: 5, kind: input, shape index: {}]   ;;  %s1552_s6 = inlined_call_operand.vmem [shape: f32[1,256], index: 6, kind: input, shape index: {}]   ;;  %s1553_s7 = inlined_call_operand.vmem [shape: f32[1,256], index: 7, kind: input, shape index: {}]   ;;  %s1554_s8 = inlined_call_operand.<no memory space> [shape: f32[1,1], index: 8, kind: input, shape index: {}]   ;;  %s1555_s9 = inlined_call_operand.hbm [shape: f32[64,128], index: 9, kind: output, shape index: {}]  }
   0x1   :  { %v14_v0 = vstv %s1554_s8 }
   0x2   :  { %15 = vst [vmem:[#allocation2] sm:$0x1] %v14_v0 }
   0x3   :  { %16 = vsyncpa [#allocation4], 0 }
   0x4   :  { %17 = vsyncpa [#allocation5], 0 }
   0x5   :  { %19 = vsyncpa [#allocation5 + $0x1], 0  ;;  %s1407_s11 = smov 0   ;;  %s1409_s12 = smov 0  }
   0x6   :  { %s1411_s13 = smov 0   ;;  %s1413_s14 = smov 0  }
   0x7 LB: > { %s1428_s8 = sadd.s32 4294967295, %s1346_s14   ;;  %s976_s15 = sadd.s32 4294967294, %s1346_s14   ;;  %s1346_s14 = sphi %s1413_s14, %s1561_s14   ;;  %s1342_s13 = sphi %s1411_s13, %s1560_s13   ;;  %s1338_s12 = sphi %s1409_s12, %s1559_s12   ;;  %s1334_s11 = sphi %s1407_s11, %s1558_s11  }
   0x8   : > { %s1432_s16 = sadd.s32 1, %s1346_s14   ;;  %s231_s17 = sadd.s32 1, %s1342_s13 }
   0x9   : > { %s228_s18 = ssub.s32 %s1346_s14, %s1432_s16  ;;  %p241_p0 = scmp.ne.s32.totalorder %s1342_s13, %s1338_s12 }
   0xa   : > { %p229_p1 = scmp.eq.s32.totalorder %s228_s18, 0  ;;  %p242_p2 = scmp.eq.s32.totalorder %s1428_s8, 1 }
   0xb   : > { %p247_p3 = scmp.ne.s32.totalorder %s1338_s12, %s1334_s11  ;;  %p248_p4 = scmp.eq.s32.totalorder %s976_s15, 1 }
   0xc   : > { %s1443_s19 = scalar_select %p229_p1, %s1342_s13, %s231_s17  }
   0xd   : > { %p1445_p5 = por %p242_p2, %p241_p0  ;;  %p1449_p6 = por %p248_p4, %p247_p3 }
   0xe   : > { %p977_p7 = scmp.ge.s32.totalorder %s1346_s14, 1  ;;  %p255_p8 = scmp.lt.s32.totalorder %s1346_s14, 3 }
   0xf   : > { %p1205_p9 = scmp.eq.s32.totalorder %s1428_s8, 0  ;;  %s275_s24 = sshll.u32 %s1551_s5, 4  ;;  %s276_s24 = int_to_ptr.hbm [resolvable:$true] %s275_s24 }
  0x10   : > { %p256_p10 = pnand %p977_p7, %p255_p8  ;;  %s1348_s25 = smov [#allocation3]  }
  0x11   : > { %s277_s26 = sshll.u32 %s1348_s25, 4  ;;  %s1349_s27 = smov 128   ;;  %s278_s26 = int_to_ptr.vmem [resolvable:$true] %s277_s26 }
  0x12   : > { %p1197_p11 = pneg %p256_p10  ;;  %s1350_s28 = smov 8  }
  0x13   : > { %320 = sbr.rel (%p256_p10) target bundleno = 584 (0x248), region = 56 }
  0x14   : > { %p1198_p12 = pnand %p1205_p9, %p1197_p11 }
  0x16   : > { %1200 = dma.hbm_to_vmem [thread:$0]  (!%p1198_p12), %s276_s24, 4096, %s278_s26, [#allocation4], %s1349_s27, %s1349_s27, %s1350_s28  }
  0x18   : > { %1325 = dma.done.wait (%p1205_p9), [#allocation4], 4096  }
  0x19   : > { %1327 = vsyncadd (%p1205_p9), [#allocation4], 4294963200  ;;  %s983_s29 = sshll.u32 %s1428_s8, 2  ;;  %v1009_v1 = vld [vmem:[%s1548_s2] sm:$0xf]  ;;  %vm471_vm0 = vcmask 130048  }
  0x1a   : > { %p363_p13 = scmp.lt.s32.totalorder %s983_s29, 7  ;;  %v1155_v2 = vld [vmem:[%s1548_s2 + $0x4] sm:$0xf0]  ;;  %v1154_v3 = vld [vmem:[%s1548_s2 + $0x4] sm:$0xf]  ;;  %vm408_vm1 = vcmask 1041408  }
  0x1b   : > { %v1010_v4 = vor.u32 %v1155_v2, %v1009_v1  ;;  %v1011_v5 = vld [vmem:[%s1548_s2 + $0x8] sm:$0xf0]  ;;  %v386_v6 = vld [vmem:[%s1549_s3] sm:$0xf]  ;;  %v1079_v10 = vld [vmem:[#allocation3 + $0x78] sm:$0xf0] }
  0x1c   : > { %s1563_s29 = smov (!%p363_p13, %s983_s29), 7  ;;  %v1014_v7 = vor.u32 %v1154_v3, %v1011_v5  ;;  %398 = vst [vmem:[#allocation1] ss:$4 sm:$0xff] %v386_v6  ;;  %v1172_v9 = vld [vmem:[#allocation3 + $0x74] sm:$0xf]  ;;  %vm401_vm2 = vcmask 31744  }
  0x1d   : > { %s984_s30 = sshll.u32 %s1563_s29, 2  ;;  %485 = vmatpush.bf16.msra.mxu2 %v1010_v4  ;;  %v1082_v11 = vor.u32 %v1172_v9, %v1079_v10  ;;  %v1077_v12 = vld [vmem:[#allocation3 + $0x70] sm:$0xf]  ;;  %v1173_v13 = vld [vmem:[#allocation3 + $0x74] sm:$0xf0]  ;;  %s359_s27 = sand.u32 1, %s1338_s12  }
  0x1e   : > { %s1469_s17 = scalar_lea.vmem %s1546_s0, %s984_s30  ;;  %504 = vmatpush.bf16.msra.mxu3 %v1014_v7  ;;  %v1141_v14 = vld [vmem:[#allocation3 + $0xf0] sm:$0xf]  ;;  %s1490_s22 = scalar_lea.vmem %s1547_s1, %s984_s30  ;;  %v1189_v15 = vld [vmem:[#allocation3 + $0xf4] sm:$0xf0]  ;;  %v1188_v16 = vld [vmem:[#allocation3 + $0xf4] sm:$0xf]  ;;  %v1078_v25 = vor.u32 %v1173_v13, %v1077_v12 }
  0x1f   : > { %v1152_v8 = vld [vmem:[%s1469_s17] sm:$0xff]  ;;  %v1170_v19 = vld [vmem:[#allocation3 + $0x64] sm:$0xf]  ;;  %v1071_v20 = vld [vmem:[#allocation3 + $0x68] sm:$0xf0]  ;;  %v1142_v26 = vor.u32 %v1189_v15, %v1141_v14  ;;  %s982_s28 = sshll.u32 %s359_s27, 5 }
  0x20   : > { %v1143_v17 = vld [vmem:[#allocation3 + $0xf8] sm:$0xf0]  ;;  %1015 = vmatmul.msk.bf16.vlgmr.msra.gmra.mxu2 %vm471_vm0, %v1152_v8  ;;  %v1069_v21 = vld [vmem:[#allocation3 + $0x60] sm:$0xf]  ;;  %v1171_v22 = vld [vmem:[#allocation3 + $0x64] sm:$0xf0]  ;;  %v1074_v32 = vor.u32 %v1170_v19, %v1071_v20 }
  0x21   : > { %v1146_v18 = vor.u32 %v1188_v16, %v1143_v17  ;;  %1017 = vmatmul.msk.bf16.vlgmr.msra.gmra.mxu3 %vm471_vm0, %v1152_v8  ;;  %778 = vmatpush.bf16.msrb.mxu2 %v1082_v11  ;;  %v1186_v23 = vld [vmem:[#allocation3 + $0xe4] sm:$0xf]  ;;  %v1156_v24 = vld [vmem:[%s1490_s22] sm:$0xff]  ;;  %v1133_v27 = vld [vmem:[#allocation3 + $0xe0] sm:$0xf]  ;;  %v1070_v39 = vor.u32 %v1171_v22, %v1069_v21  ;;  %s361_s29 = scalar_lea.vmem [#allocation6], %s982_s28 }
  0x22   : > { %v1187_v28 = vld [vmem:[#allocation3 + $0xe4] sm:$0xf0]  ;;  %v1135_v29 = vld [vmem:[#allocation3 + $0xe8] sm:$0xf0]  ;;  %v1168_v36 = vld [vmem:[#allocation3 + $0x54] sm:$0xf] }
  0x23   : > { %797 = vmatpush.bf16.msrb.mxu3 %v1146_v18  ;;  %v399_v30 = vld.sshfl [vmem:[#allocation1] sm:$0xff pattern:$0x73625140]  ;;  %v400_v31 = vld.sshfl [vmem:[#allocation1 + $0x8] sm:$0xff pattern:$0x73625140]  ;;  %v1138_v33 = vor.u32 %v1186_v23, %v1135_v29  ;;  %v1134_v40 = vor.u32 %v1187_v28, %v1133_v27 }
  0x24   : > { %v409_v34 = vsel %vm408_vm1, %v399_v30, 0  ;;  %v411_v35 = vsel %vm408_vm1, %v400_v31, 0  ;;  %v1063_v37 = vld [vmem:[#allocation3 + $0x58] sm:$0xf0]  ;;  %v1184_v38 = vld [vmem:[#allocation3 + $0xd4] sm:$0xf] }
  0x25   : > { %420 = vmatpush.bf16.msra.mxu0 %v409_v34  ;;  %439 = vmatpush.bf16.msra.mxu1 %v411_v35  ;;  %v1061_v41 = vld [vmem:[#allocation3 + $0x50] sm:$0xf]  ;;  %v1169_v42 = vld [vmem:[#allocation3 + $0x54] sm:$0xf0]  ;;  %v1127_v43 = vld [vmem:[#allocation3 + $0xd8] sm:$0xf0]  ;;  %v1066_v44 = vor.u32 %v1168_v36, %v1063_v37 }
  0x26   : > { %779 = vmatpush.bf16.msrb.mxu2 %v1074_v32  ;;  %v1125_v45 = vld [vmem:[#allocation3 + $0xd0] sm:$0xf]  ;;  %v1185_v46 = vld [vmem:[#allocation3 + $0xd4] sm:$0xf0]  ;;  %v1130_v47 = vor.u32 %v1184_v38, %v1127_v43  ;;  %v1166_v48 = vld [vmem:[#allocation3 + $0x44] sm:$0xf]  ;;  %v1062_v52 = vor.u32 %v1169_v42, %v1061_v41 }
  0x27   : > { %798 = vmatpush.bf16.msrb.mxu3 %v1138_v33  ;;  %v1055_v49 = vld [vmem:[#allocation3 + $0x48] sm:$0xf0]  ;;  %v1182_v50 = vld [vmem:[#allocation3 + $0xc4] sm:$0xf]  ;;  %v1126_v53 = vor.u32 %v1185_v46, %v1125_v45  ;;  %v1053_v54 = vld [vmem:[#allocation3 + $0x40] sm:$0xf] }
  0x28   : > { %995 = vmatmul.msk.bf16.vlgmr.msra.gmra.mxu0 %vm401_vm2, %v1156_v24  ;;  %997 = vmatmul.msk.bf16.vlgmr.msra.gmra.mxu1 %vm401_vm2, %v1156_v24  ;;  %v1119_v51 = vld [vmem:[#allocation3 + $0xc8] sm:$0xf0]  ;;  %v1058_v55 = vor.u32 %v1166_v48, %v1055_v49  ;;  %v1167_v56 = vld [vmem:[#allocation3 + $0x44] sm:$0xf0]  ;;  %v1117_v57 = vld [vmem:[#allocation3 + $0xc0] sm:$0xf] }
  0x29   : > { %740 = vmatpush.bf16.msrb.mxu0 %v1078_v25  ;;  %759 = vmatpush.bf16.msrb.mxu1 %v1142_v26  ;;  %v1183_v58 = vld [vmem:[#allocation3 + $0xc4] sm:$0xf0]  ;;  %v1122_v59 = vor.u32 %v1182_v50, %v1119_v51  ;;  %v1153_v60 = vld [vmem:[%s1469_s17 + $0x8] sm:$0xff]  ;;  %v1054_v61 = vor.u32 %v1167_v56, %v1053_v54  ;;  %v1164_v0 = vld [vmem:[#allocation3 + $0x34] sm:$0xf]  ;;  %s1190_s10 = sshll.u32 %s1428_s8, 5 }
  0x2a   : > { %780 = vmatpush.bf16.msrb.mxu2 %v1066_v44  ;;  %v1118_v62 = vor.u32 %v1183_v58, %v1117_v57  ;;  %v1157_v63 = vld [vmem:[%s1490_s22 + $0x8] sm:$0xff]  ;;  %v1045_v2 = vld [vmem:[#allocation3 + $0x30] sm:$0xf]  ;;  %v1165_v4 = vld [vmem:[#allocation3 + $0x34] sm:$0xf0]  ;;  %s886_s22 = scalar_lea.hbm %s1555_s9, %s1190_s10  ;;  %s887_s30 = sshll.u32 %s361_s29, 4  ;;  %s888_s30 = int_to_ptr.vmem [resolvable:$true] %s887_s30 }
  0x2b   : > { %799 = vmatpush.bf16.msrb.mxu3 %v1130_v47  ;;  %v1047_v1 = vld [vmem:[#allocation3 + $0x38] sm:$0xf0]  ;;  %v1109_v5 = vld [vmem:[#allocation3 + $0xb0] sm:$0xf]  ;;  %v1046_v6 = vor.u32 %v1165_v4, %v1045_v2  ;;  %v1181_v7 = vld [vmem:[#allocation3 + $0xb4] sm:$0xf0] }
  0x2c   : > { %v1050_v3 = vor.u32 %v1164_v0, %v1047_v1  ;;  %v1180_v8 = vld [vmem:[#allocation3 + $0xb4] sm:$0xf]  ;;  %v1110_v9 = vor.u32 %v1181_v7, %v1109_v5  ;;  %v1111_v10 = vld [vmem:[#allocation3 + $0xb8] sm:$0xf0]  ;;  %v1162_v12 = vld [vmem:[#allocation3 + $0x24] sm:$0xf] }
  0x2d   : > { %741 = vmatpush.bf16.msrb.mxu0 %v1070_v39  ;;  %760 = vmatpush.bf16.msrb.mxu1 %v1134_v40  ;;  %v1114_v11 = vor.u32 %v1180_v8, %v1111_v10  ;;  %v1039_v13 = vld [vmem:[#allocation3 + $0x28] sm:$0xf0]  ;;  %v1037_v15 = vld [vmem:[#allocation3 + $0x20] sm:$0xf]  ;;  %v1163_v16 = vld [vmem:[#allocation3 + $0x24] sm:$0xf0] }
  0x2e   : > { %781 = vmatpush.bf16.msrb.mxu2 %v1058_v55  ;;  %v1042_v14 = vor.u32 %v1162_v12, %v1039_v13  ;;  %v1101_v17 = vld [vmem:[#allocation3 + $0xa0] sm:$0xf]  ;;  %v1038_v18 = vor.u32 %v1163_v16, %v1037_v15  ;;  %v1179_v19 = vld [vmem:[#allocation3 + $0xa4] sm:$0xf0]  ;;  %v1178_v20 = vld [vmem:[#allocation3 + $0xa4] sm:$0xf] }
  0x2f   : > { %800 = vmatpush.bf16.msrb.mxu3 %v1122_v59  ;;  %v1103_v21 = vld [vmem:[#allocation3 + $0xa8] sm:$0xf0]  ;;  %v1102_v22 = vor.u32 %v1179_v19, %v1101_v17  ;;  %v1160_v24 = vld [vmem:[#allocation3 + $0x14] sm:$0xf]  ;;  %v1031_v25 = vld [vmem:[#allocation3 + $0x18] sm:$0xf0] }
  0x30   : > { %1016 = vmatmul.msk.bf16.gmra.mxu2 %vm471_vm0, %v1153_v60  ;;  %v1106_v23 = vor.u32 %v1178_v20, %v1103_v21  ;;  %v1029_v26 = vld [vmem:[#allocation3 + $0x10] sm:$0xf]  ;;  %v1034_v27 = vor.u32 %v1160_v24, %v1031_v25  ;;  %v1161_v28 = vld [vmem:[#allocation3 + $0x14] sm:$0xf0]  ;;  %v1176_v33 = vld [vmem:[#allocation3 + $0x94] sm:$0xf] }
  0x31   : > { %742 = vmatpush.bf16.msrb.mxu0 %v1062_v52  ;;  %761 = vmatpush.bf16.msrb.mxu1 %v1126_v53  ;;  %v1093_v29 = vld [vmem:[#allocation3 + $0x90] sm:$0xf]  ;;  %v1177_v30 = vld [vmem:[#allocation3 + $0x94] sm:$0xf0]  ;;  %v1030_v31 = vor.u32 %v1161_v28, %v1029_v26  ;;  %v1095_v34 = vld [vmem:[#allocation3 + $0x98] sm:$0xf0] }
  0x32   : > { %1018 = vmatmul.msk.bf16.gmra.mxu3 %vm471_vm0, %v1153_v60  ;;  %782 = vmatpush.bf16.msrb.mxu2 %v1050_v3  ;;  %v1094_v32 = vor.u32 %v1177_v30, %v1093_v29  ;;  %v1098_v35 = vor.u32 %v1176_v33, %v1095_v34  ;;  %v1158_v36 = vld [vmem:[#allocation3 + $0x4] sm:$0xf]  ;;  %v1023_v37 = vld [vmem:[#allocation3 + $0x8] sm:$0xf0]  ;;  %v1021_v38 = vld [vmem:[#allocation3] sm:$0xf] }
  0x33   : > { %801 = vmatpush.bf16.msrb.mxu3 %v1114_v11  ;;  %v1026_v39 = vor.u32 %v1158_v36, %v1023_v37  ;;  %v1159_v40 = vld [vmem:[#allocation3 + $0x4] sm:$0xf0]  ;;  %v1085_v41 = vld [vmem:[#allocation3 + $0x80] sm:$0xf]  ;;  %v1174_v45 = vld [vmem:[#allocation3 + $0x84] sm:$0xf] }
  0x34   : > { %v1175_v42 = vld [vmem:[#allocation3 + $0x84] sm:$0xf0]  ;;  %v1022_v43 = vor.u32 %v1159_v40, %v1021_v38  ;;  %v1087_v46 = vld [vmem:[#allocation3 + $0x88] sm:$0xf0]  ;;  %v516_v52 = vld [vmem:[%s1550_s4] sm:$0x3] }
  0x35   : > { %743 = vmatpush.bf16.msrb.mxu0 %v1054_v61  ;;  %762 = vmatpush.bf16.msrb.mxu1 %v1118_v62  ;;  %v1086_v44 = vor.u32 %v1175_v42, %v1085_v41  ;;  %v1090_v47 = vor.u32 %v1174_v45, %v1087_v46  ;;  %v518_v54 = vperm.slane %v516_v52, 0  ;;  %v519_v56 = vperm.slane %v516_v52, 1  ;;  %v816_v37 = vld [vmem:[%s1553_s7] sm:$0x3]  ;;  %s889_s17 = sshll.u32 %s886_s22, 4  ;;  %s875_s23 = scalar_lea.sflag [#allocation5], %s359_s27  ;;  %s890_s17 = int_to_ptr.hbm [resolvable:$true] %s889_s17 }
  0x36   : > { %783 = vmatpush.bf16.msrb.mxu2 %v1042_v14  ;;  %s1294_s24 = sshra.s32 %s890_s17, 4  ;;  %s1300_s28 = scalar_lea.hbm %s1555_s9, 64  ;;  %s1295_s24 = int_to_ptr.hbm [resolvable:$true] %s1294_s24 }
  0x37   : > { %802 = vmatpush.bf16.msrb.mxu3 %v1106_v23  ;;  %s1296_s25 = scalar_lea.hbm %s1295_s24, 32  ;;  %p1301_p3 = scmp.lt.s32.totalorder %s1295_s24, %s1555_s9 }
  0x38   : > { %996 = vmatmul.msk.bf16.gmra.mxu0 %vm401_vm2, %v1157_v63  ;;  %998 = vmatmul.msk.bf16.gmra.mxu1 %vm401_vm2, %v1157_v63  ;;  %p1297_p0 = scmp.ne.s32.totalorder %s1295_s24, %s1296_s25  ;;  %p1302_p4 = scmp.lt.s32.totalorder %s1300_s28, %s1296_s25 }
  0x39   : > { %744 = vmatpush.bf16.msrb.mxu0 %v1046_v6  ;;  %763 = vmatpush.bf16.msrb.mxu1 %v1110_v9 }
  0x3a   : > { %784 = vmatpush.bf16.msrb.mxu2 %v1034_v27  ;;  %p1298_p1 = pnand %p1297_p0, %p1445_p5  ;;  %p1303_p7 = por %p1302_p4, %p1301_p3 }
  0x3b   : > { %803 = vmatpush.bf16.msrb.mxu3 %v1098_v35 }
  0x3c   : > { %p1299_p2 = pneg %p1298_p1 }
  0x3d   : > { %745 = vmatpush.bf16.msrb.mxu0 %v1038_v18  ;;  %764 = vmatpush.bf16.msrb.mxu1 %v1102_v22 }
  0x3e   : > { %785 = vmatpush.bf16.msrb.mxu2 %v1026_v39  ;;  %p1304_p8 = pnand %p1303_p7, %p1299_p2 }
  0x3f   : > { %804 = vmatpush.bf16.msrb.mxu3 %v1090_v47 }
  0x41   : > { %746 = vmatpush.bf16.msrb.mxu0 %v1030_v31  ;;  %765 = vmatpush.bf16.msrb.mxu1 %v1094_v32  ;;  %v574_v31 = vld [vmem:[%s1552_s6] sm:$0x3] }
  0x42   : > { %v576_v32 = vperm.slane %v574_v31, 0  ;;  %v577_v36 = vperm.slane %v574_v31, 1 }
  0x45   : > { %747 = vmatpush.bf16.msrb.mxu0 %v1022_v43  ;;  %766 = vmatpush.bf16.msrb.mxu1 %v1086_v44  ;;  %v818_v43 = vperm.slane %v816_v37, 0  ;;  %v819_v44 = vperm.slane %v816_v37, 1 }
  0xa3   : > { %v487_v48 = vpop.f32.mrf.mxu2 }
  0xa4   : > { %v506_v49 = vpop.f32.mrf.mxu3 }
  0xa5   : > { %v422_v50 = vpop.f32.mrf.mxu0  ;;  %v441_v51 = vpop.f32.mrf.mxu1 }
  0xa6   : > { %v488_v53 = vadd.f32 %v487_v48, %v422_v50  ;;  %v507_v55 = vadd.f32 %v506_v49, %v441_v51 }
  0xa8   : > { %v522_v61 = vadd.f32 %v518_v54, %v488_v53  ;;  %v523_v62 = vadd.f32 %v519_v56, %v507_v55 }
  0xaa   : > { %v530_v3 = vmax.f32 %v522_v61, 0.0  ;;  %v531_v4 = vmax.f32 %v523_v62, 0.0 }
  0xab   : > { %v489_v57 = vpop.f32.mrf.mxu2 }
  0xac   : > { %v508_v58 = vpop.f32.mrf.mxu3 }
  0xad   : > { %v424_v59 = vpop.f32.mrf.mxu0  ;;  %v443_v60 = vpop.f32.mrf.mxu1 }
  0xae   : > { %v490_v63 = vadd.f32 %v489_v57, %v424_v59  ;;  %v509_v0 = vadd.f32 %v508_v58, %v443_v60 }
  0xb0   : > { %v524_v1 = vadd.f32 %v518_v54, %v490_v63  ;;  %v525_v2 = vadd.f32 %v519_v56, %v509_v0 }
  0xb2   : > { %v532_v5 = vmax.f32 %v524_v1, 0.0  ;;  %v533_v6 = vmax.f32 %v525_v2, 0.0 }
  0xb3   : > { %v492_v7 = vpop.f32.mrf.mxu2 }
  0xb4   : > { %v538_v9 = vpack.c.bf16 %v532_v5, %v530_v3  ;;  %v539_v10 = vpack.c.bf16 %v533_v6, %v531_v4 }
  0xb5   : > { %v511_v8 = vpop.f32.mrf.mxu3  ;;  %v427_v11 = vpop.f32.mrf.mxu0 }
  0xb6   : > { %v446_v12 = vpop.f32.mrf.mxu1  ;;  %748 = vmatmul.bf16.vlgmr.msrb.gmra.mxu0 %v538_v9  ;;  %767 = vmatmul.bf16.vlgmr.msrb.gmra.mxu1 %v539_v10  ;;  %v493_v13 = vadd.f32 %v492_v7, %v427_v11 }
  0xb7   : > { %786 = vmatmul.bf16.vlgmr.msrb.gmra.mxu2 %v538_v9  ;;  %805 = vmatmul.bf16.vlgmr.msrb.gmra.mxu3 %v539_v10  ;;  %v512_v14 = vadd.f32 %v511_v8, %v446_v12 }
  0xb8   : > { %v526_v19 = vadd.f32 %v518_v54, %v493_v13 }
  0xb9   : > { %v527_v20 = vadd.f32 %v519_v56, %v512_v14 }
  0xba   : > { %v534_v25 = vmax.f32 %v526_v19, 0.0 }
  0xbb   : > { %v494_v15 = vpop.f32.mrf.mxu2  ;;  %v535_v26 = vmax.f32 %v527_v20, 0.0 }
  0xbd   : > { %v513_v16 = vpop.f32.mrf.mxu3  ;;  %v429_v17 = vpop.f32.mrf.mxu0 }
  0xbe   : > { %v448_v18 = vpop.f32.mrf.mxu1  ;;  %v495_v21 = vadd.f32 %v494_v15, %v429_v17  ;;  %v1351_v17 = vmov 0  }
  0xbf   : > { %v514_v22 = vadd.f32 %v513_v16, %v448_v18  ;;  %1246 = vset.pattern.permute.xlu2 %v1351_v17  ;;  %1247 = vset.pattern.permute.xlu0 %v1351_v17  ;;  %v1249_v18 = vld [vmem:[#allocation2] ss:$0 sm:$0xff] }
  0xc0   : > { %v528_v23 = vadd.f32 %v518_v54, %v495_v21  ;;  %1248 = vset.pattern.permute.xlu1 %v1351_v17 }
  0xc1   : > { %v529_v24 = vadd.f32 %v519_v56, %v514_v22 }
  0xc2   : > { %v536_v27 = vmax.f32 %v528_v23, 0.0 }
  0xc3   : > { %v537_v28 = vmax.f32 %v529_v24, 0.0 }
  0xc4   : > { %v540_v29 = vpack.c.bf16 %v536_v27, %v534_v25 }
  0xc5   : > { %v541_v30 = vpack.c.bf16 %v537_v28, %v535_v26 }
  0xc6   : > { %753 = vmatmul.bf16.gmra.mxu0 %v540_v29 }
  0xc7   : > { %772 = vmatmul.bf16.gmra.mxu1 %v541_v30  ;;  %791 = vmatmul.bf16.gmra.mxu2 %v540_v29 }
  0xc8   : > { %810 = vmatmul.bf16.gmra.mxu3 %v541_v30 }
 0x133   : > { %v749_v33 = vpop.f32.mrf.mxu0  ;;  %v768_v34 = vpop.f32.mrf.mxu1 }
 0x134   : > { %v750_v35 = vadd.f32 %v749_v33, %v576_v32 }
 0x136   : > { %v769_v40 = vadd.f32 %v768_v34, %v750_v35 }
 0x138   : > { %v822_v48 = vmul.f32 %v818_v43, %v769_v40 }
 0x13a   : > { %v787_v38 = vpop.f32.mrf.mxu2  ;;  %v806_v39 = vpop.f32.mrf.mxu3 }
 0x13b   : > { %v788_v41 = vadd.f32 %v787_v38, %v577_v36  ;;  %v751_v42 = vpop.f32.mrf.mxu0  ;;  %v770_v46 = vpop.f32.mrf.mxu1 }
 0x13c   : > { %v752_v47 = vadd.f32 %v751_v42, %v576_v32 }
 0x13d   : > { %v807_v45 = vadd.f32 %v806_v39, %v788_v41 }
 0x13e   : > { %v771_v53 = vadd.f32 %v770_v46, %v752_v47 }
 0x13f   : > { %v823_v49 = vmul.f32 %v819_v44, %v807_v45 }
 0x140   : > { %v824_v57 = vmul.f32 %v818_v43, %v771_v53 }
 0x141   : > { %v830_v50 = vadd.f32 %v823_v49, %v822_v48 }
 0x142   : > { %v789_v51 = vpop.f32.mrf.mxu2  ;;  %v808_v52 = vpop.f32.mrf.mxu3 }
 0x143   : > { %v790_v54 = vadd.f32 %v789_v51, %v577_v36  ;;  %831 = vadd.xlane.f32.xlu0 %v830_v50  ;;  %v754_v55 = vpop.f32.mrf.mxu0 }
 0x144   : > { %v755_v59 = vadd.f32 %v754_v55, %v576_v32  ;;  %v773_v60 = vpop.f32.mrf.mxu1 }
 0x145   : > { %v809_v56 = vadd.f32 %v808_v52, %v790_v54 }
 0x146   : > { %v774_v0 = vadd.f32 %v773_v60, %v755_v59 }
 0x147   : > { %v825_v58 = vmul.f32 %v819_v44, %v809_v56 }
 0x148   : > { %v826_v5 = vmul.f32 %v818_v43, %v774_v0 }
 0x149   : > { %v833_v61 = vadd.f32 %v825_v58, %v824_v57 }
 0x14a   : > { %v792_v62 = vpop.f32.mrf.mxu2 }
 0x14b   : > { %v811_v63 = vpop.f32.mrf.mxu3  ;;  %v793_v1 = vadd.f32 %v792_v62, %v577_v36  ;;  %834 = vadd.xlane.f32.xlu0 %v833_v61  ;;  %v756_v2 = vpop.f32.mrf.mxu0 }
 0x14c   : > { %v757_v4 = vadd.f32 %v756_v2, %v576_v32  ;;  %v775_v8 = vpop.f32.mrf.mxu1 }
 0x14d   : > { %v812_v3 = vadd.f32 %v811_v63, %v793_v1 }
 0x14e   : > { %v776_v10 = vadd.f32 %v775_v8, %v757_v4 }
 0x14f   : > { %v827_v6 = vmul.f32 %v819_v44, %v812_v3 }
 0x150   : > { %v828_v14 = vmul.f32 %v818_v43, %v776_v10 }
 0x151   : > { %v836_v7 = vadd.f32 %v827_v6, %v826_v5 }
 0x152   : > { %v794_v9 = vpop.f32.mrf.mxu2 }
 0x153   : > { %v795_v11 = vadd.f32 %v794_v9, %v577_v36  ;;  %837 = vadd.xlane.f32.xlu1 %v836_v7  ;;  %v813_v12 = vpop.f32.mrf.mxu3 }
 0x155   : > { %v814_v13 = vadd.f32 %v813_v12, %v795_v11 }
 0x157   : > { %v829_v15 = vmul.f32 %v819_v44, %v814_v13 }
 0x159   : > { %v839_v16 = vadd.f32 %v829_v15, %v828_v14 }
 0x15b   : > { %840 = vadd.xlane.f32.xlu1 %v839_v16 }
 0x1b6   : > { %v832_v19 = vpop.xlane.xlu0 %831 }
 0x1b7   : > { %v846_v20 = vadd.f32 %v1249_v18, %v832_v19 }
 0x1b9   : > { %852 = vperm.xlu2 %1246, %v846_v20  }
 0x1be   : > { %v835_v21 = vpop.xlane.xlu0 %834 }
 0x1bf   : > { %v847_v22 = vadd.f32 %v1249_v18, %v835_v21 }
 0x1c1   : > { %857 = vperm.xlu2 %1246, %v847_v22  }
 0x1c6   : > { %v838_v23 = vpop.xlane.xlu1 %837 }
 0x1c7   : > { %v848_v24 = vadd.f32 %v1249_v18, %v838_v23 }
 0x1c9   : > { %862 = vperm.xlu0 %1247, %v848_v24  }
 0x1ce   : > { %v841_v25 = vpop.xlane.xlu1 %840 }
 0x1cf   : > { %v849_v26 = vadd.f32 %v1249_v18, %v841_v25 }
 0x1d1   : > { %867 = vperm.xlu1 %1248, %v849_v26  }
 0x213   : > { %v853_v27 = vpop.permute.xlu2 %852 }
 0x214   : > { %870 = vst [vmem:[%s361_s29] sm:$0xff] %v853_v27 }
 0x21b   : > { %v858_v28 = vpop.permute.xlu2 %857 }
 0x21c   : > { %871 = vst [vmem:[%s361_s29 + $0x8] sm:$0xff] %v858_v28 }
 0x23b   : > { %v863_v29 = vpop.permute.xlu0 %862 }
 0x23c   : > { %872 = vst [vmem:[%s361_s29 + $0x10] sm:$0xff] %v863_v29 }
 0x243   : > { %v868_v30 = vpop.permute.xlu1 %867 }
 0x244   : > { %873 = vst [vmem:[%s361_s29 + $0x18] sm:$0xff] %v868_v30 }
 0x245   : > { %1307 = shalt.err (!%p1304_p8)
}
 0x246   : > { %s1352_s27 = smov 128   ;;  %s1353_s29 = smov 8  }
 0x247   : > { %1195 = dma.vmem_to_hbm [thread:$0]  (%p1445_p5), %s888_s30, 512, %s890_s17, %s875_s23, %s1352_s27, %s1352_s27, %s1353_s29  }
 0x248 PF: > { %p1207_p9 = scmp.ge.s32.totalorder %s1346_s14, 2  ;;  %s904_s18 = sand.u32 1, %s1334_s11  }
 0x249   : > { %s905_s22 = scalar_lea.sflag [#allocation5], %s904_s18 }
 0x24a   : > { %p1202_p10 = pnand %p1207_p9, %p1449_p6 }
 0x24c   : > { %p1203_p11 = pneg %p1202_p10 }
 0x24e   : > { %1329 = dma.done.wait (%p1203_p11), %s905_s22, 512  }
 0x24f   : > { %1331 = vsyncadd (%p1203_p11), %s905_s22, 4294966784  ;;  %p22_p12 = scmp.ge.s32.totalorder %s1432_s16, 4   ;;  %s1558_s11 = smov %s1338_s12 }
 0x250   : > { %s1559_s12 = smov %s1342_s13  ;;  %s1560_s13 = smov %s1443_s19 }
 0x251   : > { %s1561_s14 = smov %s1432_s16  ;;  %24 = sbr.rel (!%p22_p12) target bundleno = 7 (0x7), region = 99 }
 0x256   :  { %911 = vsyncpa [#allocation4], 1 }
 0x257   :  { %913 = vsyncpa [#allocation4 + $0x1], 1 }
 0x258   :  { %914 = vsyncpa [#allocation5], 1 }
 0x259   :  { %916 = vsyncpa [#allocation5 + $0x1], 1 }

</bundles_post_ra>
